<compile_context>
chip_gen: v5e
topology: v5e:2x2
jax: 0.10.0
libtpu: 0.0.40
codegen_flags: <defaults>
</compile_context>

<pallas_src>
from functools import partial

import jax
import jax.numpy as jnp
from jax.experimental import pallas as pl
from jax.experimental.pallas import tpu as pltpu


_TARGET_BLOCK_BYTES = 2 * 1024 * 1024   # per-input per-step DMA block target
_FLOOR_BLOCK_BYTES = 1 * 1024 * 1024    # don't shrink below this for grid count
_MIN_GRID_BLOCKS = 8                    # pipeline ramp + v7x megacore headroom


def _focal_pow(x, gamma):
    """(1 - p_t)**gamma without the exp+log jnp.power fallback for common gammas."""
    if gamma == 0.0:
        return jnp.ones_like(x)
    if gamma == 0.5:
        return jnp.sqrt(x)
    if gamma == 1.0:
        return x
    if gamma == 1.5:
        return x * jnp.sqrt(x)
    if gamma == 2.0:
        return x * x
    if gamma == 2.5:
        return (x * x) * jnp.sqrt(x)
    if gamma == 3.0:
        return (x * x) * x
    return jnp.power(x, gamma)  # generic fallback (adds exp+log per element)


def _channel_loss(x, t, gamma, alpha):
    """x, t: (C, ...spatial) float32.  Returns loss summed over the channel axis
    (keepdims=True), i.e. shape (1, ...spatial)."""
    # --- log-softmax over the channel axis (axis 0) ---------------------------
    m = jnp.max(x, axis=0, keepdims=True)
    xs = x - m
    e = jnp.exp(xs)
    denom = jnp.sum(e, axis=0, keepdims=True)
    log_denom = jnp.log(denom)                      # the only full-size log
    # probs still needed for the focal modulation; exact reciprocal only on the
    # channel-reduced denominator (1/C of the elementwise work).
    p = e * pl.reciprocal(denom, approx=False)

    # PyTorch binary_cross_entropy clamps log terms at -100.
    log_p = jnp.maximum(xs - log_denom, -100.0)
    # log(1-p) = log(denom - e) - log(denom); subtraction cancels near p->1,
    # matching the reference (which also computes 1 - probs by subtraction).
    log_1mp = jnp.maximum(jnp.log(jnp.maximum(denom - e, 0.0)) - log_denom,
                          -100.0)
    bce = -(log_1mp + t * (log_p - log_1mp))

    # --- focal modulation -----------------------------------------------------
    one_m_pt = jnp.maximum(p + t - 2.0 * t * p, 0.0)          # 1 - p_t
    mod = _focal_pow(one_m_pt, gamma)
    alpha_factor = (1.0 - alpha) + (2.0 * alpha - 1.0) * t
    loss = bce * (alpha_factor * mod)

    # Reduce channels BEFORE any ragged masking (mask cost drops to 1/C).
    return jnp.sum(loss, axis=0, keepdims=True)


def _write_tile_sum(out_ref, tile_sum):
    # Partial sum into lane 0, zeros elsewhere -> wrapper reduces with a plain
    # jnp.sum(partials) (no strided-gather slice).
    lane = jax.lax.broadcasted_iota(jnp.int32, out_ref.shape, out_ref.ndim - 1)
    out_ref[...] = jnp.where(lane == 0, tile_sum, 0.0)


def _focal_kernel_4d(x_ref, t_ref, out_ref, *, s, s_tile, gamma, alpha,
                     needs_mask):
    # x_ref, t_ref : (1, C, S_TILE, 128) VMEM tiles; out_ref : (1, 1, 1, 128).
    x = x_ref[0].astype(jnp.float32)                 # (C, S_TILE, 128)
    t = t_ref[0].astype(jnp.float32)
    rows = _channel_loss(x, t, gamma, alpha)         # (1, S_TILE, 128)
    if needs_mask:  # ragged last S-tile: mask the channel-reduced rows only
        j = pl.program_id(1)
        sidx = jax.lax.broadcasted_iota(jnp.int32, rows.shape, 1)
        rows = jnp.where(j * s_tile + sidx < s, rows, 0.0)   # select: NaNs don't leak
    _write_tile_sum(out_ref, jnp.sum(rows))


def _focal_kernel_3d(x_ref, t_ref, out_ref, *, hw, hw_tile, gamma, alpha,
                     needs_mask):
    # x_ref, t_ref : (1, C, HW_TILE) VMEM tiles; out_ref : (1, 1, 1, 128).
    x = x_ref[0].astype(jnp.float32)                 # (C, HW_TILE)
    t = t_ref[0].astype(jnp.float32)
    row = _channel_loss(x, t, gamma, alpha)          # (1, HW_TILE)
    if needs_mask:  # ragged last spatial tile: mask the channel-reduced row only
        j = pl.program_id(1)
        lane = jax.lax.broadcasted_iota(jnp.int32, row.shape, 1)
        row = jnp.where(j * hw_tile + lane < hw, row, 0.0)   # select: NaNs don't leak
    _write_tile_sum(out_ref, jnp.sum(row))


def _choose_s_tile(C, S, N, itemsize):
    """S_TILE (rows of 128 lanes) for the (N, C, S, 128) layout.

    Multiple of 8 (or == S).  Targets ~2 MiB per input block, keeps >= ~1 MiB
    when shrinking for grid-block count, but always guarantees >= 2 grid blocks
    when S allows so both v7x TensorCores get work even for N == 1."""
    if S <= 8:
        return S
    row_bytes = C * 128 * itemsize
    target = max(8, (_TARGET_BLOCK_BYTES // row_bytes) // 8 * 8)
    floor = max(8, (_FLOOR_BLOCK_BYTES // row_bytes) // 8 * 8)
    tile = min(target, S)
    for min_blocks, min_tile in ((_MIN_GRID_BLOCKS, floor), (2, 8)):
        while N * pl.cdiv(S, tile) < min_blocks and tile > min_tile:
            tile = max(min_tile, (tile // 2) // 8 * 8)
    tile = max(8, (tile // 8) * 8)
    return S if tile >= S else tile


def _choose_hw_tile(C, HW, N, itemsize):
    """HW_TILE (lanes) for the (N, C, HW) layout: multiple of 128 (or == HW)."""
    if HW <= 128:
        return HW
    col_bytes = C * itemsize
    target = max(128, (_TARGET_BLOCK_BYTES // col_bytes) // 128 * 128)
    floor = max(128, (_FLOOR_BLOCK_BYTES // col_bytes) // 128 * 128)
    tile = min(target, HW)
    for min_blocks, min_tile in ((_MIN_GRID_BLOCKS, floor), (2, 128)):
        while N * pl.cdiv(HW, tile) < min_blocks and tile > min_tile:
            tile = max(min_tile, (tile // 2) // 128 * 128)
    tile = max(128, (tile // 128) * 128)
    return HW if tile >= HW else tile


def bce_with_softmax_focal_loss(x_nchw, target_nchw, *, gamma=1.5, alpha=0.25,
                                weight=None, reduction="mean"):
    """x_nchw, target_nchw: (N, C, H, W) arrays.  Returns scalar loss.

    Pass bf16 inputs end-to-end if accuracy allows (halves HBM traffic on
    v5e/v6e); the kernel upcasts to f32 in VMEM.  Note: reduction='sum' returns
    loss.sum() / (2*N), mirroring the PyTorch module (not a true sum)."""
    if weight is not None:
        # TODO(synk): per-element BCE `weight` tensor not implemented (module default is None).
        raise NotImplementedError("weight is not supported")

    N, C, H, W = x_nchw.shape
    HW = H * W
    itemsize = max(jnp.dtype(x_nchw.dtype).itemsize,
                   jnp.dtype(target_nchw.dtype).itemsize)

    # Small-C layout: split HW into (S, 128) so channels sit on the leading
    # (repeat) axis -> full vregs and VPU-only channel reductions.
    use_4d = (HW % 128 == 0) and (C * itemsize < 32)

    if use_4d:
        S = HW // 128
        x = x_nchw.reshape(N, C, S, 128)          # free minor-dim split
        t = target_nchw.reshape(N, C, S, 128)
        s_tile = _choose_s_tile(C, S, N, itemsize)
        num_tiles = pl.cdiv(S, s_tile)
        needs_mask = (S % s_tile) != 0
        kernel = partial(_focal_kernel_4d, s=S, s_tile=s_tile,
                         gamma=float(gamma), alpha=float(alpha),
                         needs_mask=needs_mask)
        in_specs = [
            pl.BlockSpec((1, C, s_tile, 128), lambda i, j: (i, 0, j, 0)),
            pl.BlockSpec((1, C, s_tile, 128), lambda i, j: (i, 0, j, 0)),
        ]
    else:
        x = x_nchw.reshape(N, C, HW)
        t = target_nchw.reshape(N, C, HW)
        hw_tile = _choose_hw_tile(C, HW, N, itemsize)
        num_tiles = pl.cdiv(HW, hw_tile)
        needs_mask = (HW % hw_tile) != 0
        kernel = partial(_focal_kernel_3d, hw=HW, hw_tile=hw_tile,
                         gamma=float(gamma), alpha=float(alpha),
                         needs_mask=needs_mask)
        in_specs = [
            pl.BlockSpec((1, C, hw_tile), lambda i, j: (i, 0, j)),
            pl.BlockSpec((1, C, hw_tile), lambda i, j: (i, 0, j)),
        ]

    elems = N * C * HW
    cost = pl.CostEstimate(
        flops=int(25 * elems),
        transcendentals=int(3 * elems),                    # exp + log + sqrt
        bytes_accessed=int(2 * elems * itemsize + N * num_tiles * 128 * 4),
    )

    partials = pl.pallas_call(
        kernel,
        out_shape=jax.ShapeDtypeStruct((N, num_tiles, 1, 128), jnp.float32),
        grid_spec=pltpu.PrefetchScalarGridSpec(
            num_scalar_prefetch=0,
            grid=(N, num_tiles),
            in_specs=in_specs,
            out_specs=pl.BlockSpec((1, 1, 1, 128), lambda i, j: (i, j, 0, 0)),
        ),
        compiler_params=pltpu.CompilerParams(
            dimension_semantics=("parallel", "parallel"),
            vmem_limit_bytes=48 * 1024 * 1024,
        ),
        cost_estimate=cost,
    )(x, t)

    total = jnp.sum(partials)     # tile sums sit in lane 0, zeros elsewhere
    if reduction == "mean":
        return total / (N * C * HW)
    elif reduction == "sum":
        return total / (2 * N)    # mirrors the PyTorch module's 'sum' branch
    else:
        # TODO(synk): reduction='none' needs the full per-element loss map; this
        # kernel only produces per-tile partial sums.
        raise NotImplementedError("reduction='none' is not supported")


def _reference(x, target, gamma, alpha, reduction):
    probs = jax.nn.softmax(x, axis=1)
    log_p = jnp.maximum(jnp.log(probs), -100.0)
    log_1mp = jnp.maximum(jnp.log(1.0 - probs), -100.0)
    bce = -(target * log_p + (1.0 - target) * log_1mp)
    p_t = target * probs + (1.0 - target) * (1.0 - probs)
    alpha_factor = target * alpha + (1.0 - target) * (1.0 - alpha)
    mod = (1.0 - p_t) ** gamma
    loss = bce * alpha_factor * mod
    if reduction == "mean":
        return jnp.mean(loss)
    return jnp.sum(loss) / (2 * x.shape[0])


if __name__ == "__main__":
    key = jax.random.PRNGKey(0)
    k1, k2, k3, k4 = jax.random.split(key, 4)

    # Case 1: small C, HW % 128 == 0 -> 4D (N, C, S, 128) layout, gamma=1.5, 'mean'
    N, C, H, W = 2, 4, 16, 16
    GAMMA, ALPHA = 1.5, 0.25
    x = jax.random.normal(k1, (N, C, H, W), dtype=jnp.float32)
    target = jax.random.uniform(k2, (N, C, H, W), dtype=jnp.float32)  # BCE targets in [0,1]
    loss = bce_with_softmax_focal_loss(x, target, gamma=GAMMA, alpha=ALPHA,
                                       reduction="mean")
    loss = jax.block_until_ready(loss)
    ref = _reference(x, target, GAMMA, ALPHA, "mean")
    assert jnp.allclose(loss, ref, rtol=1e-4, atol=1e-5), (loss, ref)

    # Case 2: larger C, ragged HW -> 3D (N, C, HW) layout with masked last tile,
    # gamma=2.0, 'sum' reduction.
    N2, C2, H2, W2 = 2, 8, 9, 15
    G2, A2 = 2.0, 0.25
    x2 = jax.random.normal(k3, (N2, C2, H2, W2), dtype=jnp.float32)
    t2 = jax.random.uniform(k4, (N2, C2, H2, W2), dtype=jnp.float32)
    loss2 = bce_with_softmax_focal_loss(x2, t2, gamma=G2, alpha=A2,
                                        reduction="sum")
    loss2 = jax.block_until_ready(loss2)
    ref2 = _reference(x2, t2, G2, A2, "sum")
    assert jnp.allclose(loss2, ref2, rtol=1e-4, atol=1e-5), (loss2, ref2)

    print("KERNEL_OK")
</pallas_src>

<mosaic_0001>
module attributes {stable_mosaic.version = 11 : i64} {
  func.func @_focal_kernel_4d(%arg0: i32, %arg1: i32, %arg2: memref<1x4x2x128xf32, #tpu.memory_space<vmem>>, %arg3: memref<1x4x2x128xf32, #tpu.memory_space<vmem>>, %arg4: memref<1x1x1x128xf32, #tpu.memory_space<vmem>>) attributes {dimension_semantics = [#tpu.dimension_semantics<parallel>, #tpu.dimension_semantics<parallel>], iteration_bounds = array<i64: 2, 1>, scalar_prefetch = 0 : i64, scratch_operands = 0 : i64, tpu.core_type = #tpu.core_type<tc>, window_params = [{transform_indices = @transform_0, window_bounds = array<i64: 1, 4, 2, 128>}, {transform_indices = @transform_1, window_bounds = array<i64: 1, 4, 2, 128>}, {transform_indices = @transform_2, window_bounds = array<i64: 1, 1, 1, 128>}]} {
    %c0 = arith.constant 0 : index
    %c0_0 = arith.constant 0 : index
    %c0_1 = arith.constant 0 : index
    %c0_2 = arith.constant 0 : index
    %0 = vector.load %arg2[%c0, %c0_0, %c0_1, %c0_2] : memref<1x4x2x128xf32, #tpu.memory_space<vmem>>, vector<1x4x2x128xf32>
    %1 = vector.shape_cast %0 : vector<1x4x2x128xf32> to vector<4x2x128xf32>
    %c0_3 = arith.constant 0 : index
    %c0_4 = arith.constant 0 : index
    %c0_5 = arith.constant 0 : index
    %c0_6 = arith.constant 0 : index
    %2 = vector.load %arg3[%c0_3, %c0_4, %c0_5, %c0_6] : memref<1x4x2x128xf32, #tpu.memory_space<vmem>>, vector<1x4x2x128xf32>
    %3 = vector.shape_cast %2 : vector<1x4x2x128xf32> to vector<4x2x128xf32>
    %cst = arith.constant dense<0xFF800000> : vector<2x128xf32>
    %4 = vector.multi_reduction <maximumf>, %1, %cst [0] : vector<4x2x128xf32> to vector<2x128xf32>
    %5 = vector.shape_cast %4 : vector<2x128xf32> to vector<1x2x128xf32>
    %6 = vector.broadcast %5 : vector<1x2x128xf32> to vector<4x2x128xf32>
    %7 = arith.subf %1, %6 : vector<4x2x128xf32>
    %8 = math.exp %7 : vector<4x2x128xf32>
    %cst_7 = arith.constant dense<0.000000e+00> : vector<2x128xf32>
    %9 = vector.multi_reduction <add>, %8, %cst_7 [0] : vector<4x2x128xf32> to vector<2x128xf32>
    %10 = vector.shape_cast %9 : vector<2x128xf32> to vector<1x2x128xf32>
    %11 = math.log %10 : vector<1x2x128xf32>
    %12 = tpu.reciprocal %10 : vector<1x2x128xf32> -> vector<1x2x128xf32>
    %13 = vector.broadcast %12 : vector<1x2x128xf32> to vector<4x2x128xf32>
    %14 = arith.mulf %8, %13 : vector<4x2x128xf32>
    %15 = vector.broadcast %11 : vector<1x2x128xf32> to vector<4x2x128xf32>
    %16 = arith.subf %7, %15 : vector<4x2x128xf32>
    %cst_8 = arith.constant -1.000000e+02 : f32
    %17 = vector.broadcast %cst_8 : f32 to vector<4x2x128xf32>
    %18 = arith.maximumf %16, %17 : vector<4x2x128xf32>
    %19 = vector.broadcast %10 : vector<1x2x128xf32> to vector<4x2x128xf32>
    %20 = arith.subf %19, %8 : vector<4x2x128xf32>
    %cst_9 = arith.constant 0.000000e+00 : f32
    %21 = vector.broadcast %cst_9 : f32 to vector<4x2x128xf32>
    %22 = arith.maximumf %20, %21 : vector<4x2x128xf32>
    %23 = math.log %22 : vector<4x2x128xf32>
    %24 = vector.broadcast %11 : vector<1x2x128xf32> to vector<4x2x128xf32>
    %25 = arith.subf %23, %24 : vector<4x2x128xf32>
    %cst_10 = arith.constant -1.000000e+02 : f32
    %26 = vector.broadcast %cst_10 : f32 to vector<4x2x128xf32>
    %27 = arith.maximumf %25, %26 : vector<4x2x128xf32>
    %28 = arith.subf %18, %27 : vector<4x2x128xf32>
    %29 = arith.mulf %3, %28 : vector<4x2x128xf32>
    %30 = arith.addf %27, %29 : vector<4x2x128xf32>
    %cst_11 = arith.constant 0.000000e+00 : f32
    %31 = vector.broadcast %cst_11 : f32 to vector<4x2x128xf32>
    %32 = arith.subf %31, %30 : vector<4x2x128xf32>
    %33 = arith.addf %14, %3 : vector<4x2x128xf32>
    %cst_12 = arith.constant 2.000000e+00 : f32
    %34 = vector.broadcast %cst_12 : f32 to vector<4x2x128xf32>
    %35 = arith.mulf %34, %3 : vector<4x2x128xf32>
    %36 = arith.mulf %35, %14 : vector<4x2x128xf32>
    %37 = arith.subf %33, %36 : vector<4x2x128xf32>
    %cst_13 = arith.constant 0.000000e+00 : f32
    %38 = vector.broadcast %cst_13 : f32 to vector<4x2x128xf32>
    %39 = arith.maximumf %37, %38 : vector<4x2x128xf32>
    %40 = math.sqrt %39 : vector<4x2x128xf32>
    %41 = arith.mulf %39, %40 : vector<4x2x128xf32>
    %cst_14 = arith.constant -5.000000e-01 : f32
    %42 = vector.broadcast %cst_14 : f32 to vector<4x2x128xf32>
    %43 = arith.mulf %42, %3 : vector<4x2x128xf32>
    %cst_15 = arith.constant 7.500000e-01 : f32
    %44 = vector.broadcast %cst_15 : f32 to vector<4x2x128xf32>
    %45 = arith.addf %44, %43 : vector<4x2x128xf32>
    %46 = arith.mulf %45, %41 : vector<4x2x128xf32>
    %47 = arith.mulf %32, %46 : vector<4x2x128xf32>
    %cst_16 = arith.constant dense<0.000000e+00> : vector<2x128xf32>
    %48 = vector.multi_reduction <add>, %47, %cst_16 [0] : vector<4x2x128xf32> to vector<2x128xf32>
    %49 = vector.shape_cast %48 : vector<2x128xf32> to vector<1x2x128xf32>
    %50 = vector.shape_cast %49 : vector<1x2x128xf32> to vector<1x1x2x128xf32>
    %cst_17 = arith.constant dense<0.000000e+00> : vector<1xf32>
    %51 = vector.multi_reduction <add>, %50, %cst_17 [1, 2, 3] : vector<1x1x2x128xf32> to vector<1xf32>
    %52 = vector.shape_cast %51 : vector<1xf32> to vector<1x1x1x1xf32>
    %53 = vector.extract %52[0, 0, 0, 0] : f32 from vector<1x1x1x1xf32>
    %54 = tpu.iota {dimensions = array<i32: 3>} : vector<1x1x1x128xi32>
    %c0_i32 = arith.constant 0 : i32
    %55 = vector.broadcast %c0_i32 : i32 to vector<1x1x1x128xi32>
    %56 = arith.cmpi eq, %54, %55 : vector<1x1x1x128xi32>
    %cst_18 = arith.constant 0.000000e+00 : f32
    %57 = vector.broadcast %53 : f32 to vector<1x1x1x128xf32>
    %58 = vector.broadcast %cst_18 : f32 to vector<1x1x1x128xf32>
    %59 = arith.select %56, %57, %58 : vector<1x1x1x128xi1>, vector<1x1x1x128xf32>
    %c0_19 = arith.constant 0 : index
    %c0_20 = arith.constant 0 : index
    %c0_21 = arith.constant 0 : index
    %c0_22 = arith.constant 0 : index
    %60 = vector.load %arg4[%c0_19, %c0_20, %c0_21, %c0_22] : memref<1x1x1x128xf32, #tpu.memory_space<vmem>>, vector<1x1x1x128xf32>
    tpu.vector_store %arg4[%c0_19, %c0_20, %c0_21, %c0_22], %59 {strides = array<i32>} : memref<1x1x1x128xf32, #tpu.memory_space<vmem>>, vector<1x1x1x128xf32>,
    return
  }
  func.func @transform_0(%arg0: i32, %arg1: i32) -> (i32, i32, i32, i32) {
    %c0_i32 = arith.constant 0 : i32
    %c0_i32_0 = arith.constant 0 : i32
    %c0_i32_1 = arith.constant 0 : i32
    return %arg0, %c0_i32, %arg1, %c0_i32_0 : i32, i32, i32, i32
  }
  func.func @transform_1(%arg0: i32, %arg1: i32) -> (i32, i32, i32, i32) {
    %c0_i32 = arith.constant 0 : i32
    %c0_i32_0 = arith.constant 0 : i32
    %c0_i32_1 = arith.constant 0 : i32
    return %arg0, %c0_i32, %arg1, %c0_i32_0 : i32, i32, i32, i32
  }
  func.func @transform_2(%arg0: i32, %arg1: i32) -> (i32, i32, i32, i32) {
    %c0_i32 = arith.constant 0 : i32
    %c0_i32_0 = arith.constant 0 : i32
    %c0_i32_1 = arith.constant 0 : i32
    return %arg0, %arg1, %c0_i32, %c0_i32_0 : i32, i32, i32, i32
  }
}

</mosaic_0001>

<bundles_post_ra>
// kernel: tpu_custom_call.1
= control target key start
LH: loop header
LB: loop body
LE: loop exit
PB: predicated region body
PF: predicated region fallthrough
CT: control target
= control target key end

     0   :  { %7 = vsyncpa [#allocation3], 0  ;;  %s1100_s0 = inlined_call_operand.hbm [shape: f32[2,4,2,128], index: 0, kind: input, shape index: {}]   ;;  %s1101_s1 = inlined_call_operand.hbm [shape: f32[2,4,2,128], index: 1, kind: input, shape index: {}]   ;;  %s1102_s2 = inlined_call_operand.hbm [shape: f32[2,1,1,128], index: 2, kind: output, shape index: {}]  }
   0x1   :  { %9 = vsyncpa [#allocation3 + $0x1], 0 }
   0x2   :  { %10 = vsyncpa [#allocation6], 0 }
   0x3   :  { %12 = vsyncpa [#allocation6 + $0x1], 0 }
   0x4   :  { %13 = vsyncpa [#allocation4], 0 }
   0x5   :  { %15 = vsyncpa [#allocation4 + $0x1], 0  ;;  %s836_s9 = smov 0   ;;  %s838_s10 = smov 0  }
   0x6   :  { %s840_s11 = smov 0   ;;  %s842_s12 = smov 0  }
   0x7   :  { %s844_s13 = smov 0   ;;  %s846_s14 = smov 0  }
   0x8 LB: > { %s555_s15 = sadd.s32 4294967295, %s817_s14   ;;  %s556_s16 = sadd.s32 4294967294, %s817_s14   ;;  %s817_s14 = sphi %s846_s14, %s21_s14   ;;  %s813_s13 = sphi %s844_s13, %s1112_s13   ;;  %s809_s12 = sphi %s842_s12, %s1111_s12   ;;  %s805_s11 = sphi %s840_s11, %s1110_s11   ;;  %s801_s10 = sphi %s838_s10, %s1109_s10   ;;  %s797_s9 = sphi %s836_s9, %s1108_s9  }
   0x9   : > { %s33_s17 = sadd.s32 1, %s813_s13  ;;  %s42_s18 = sadd.s32 1, %s805_s11 }
   0xa   : > { %p35_p0 = scmp.ge.s32.totalorder %s33_s17, 2  ;;  %p49_p1 = scmp.ne.s32.totalorder %s805_s11, %s801_s10 }
   0xb   : > { %p50_p2 = scmp.eq.s32.totalorder %s817_s14, 0  ;;  %p55_p3 = scmp.ne.s32.totalorder %s801_s10, %s797_s9 }
   0xc   : > { %s1114_s17 = smov (%p35_p0, %s33_s17), 0  ;;  %p56_p5 = scmp.eq.s32.totalorder %s555_s15, 0 }
   0xd   : > { %p877_p4 = por %p50_p2, %p49_p1  ;;  %s37_s20 = ssub.s32 %s813_s13, %s1114_s17 }
   0xe   : > { %p109_p6 = scmp.eq.s32.totalorder %s555_s15, 1  ;;  %p40_p7 = scmp.eq.s32.totalorder %s37_s20, 0 }
   0xf   : > { %p883_p8 = por %p56_p5, %p55_p3  ;;  %p115_p10 = scmp.eq.s32.totalorder %s556_s16, 1 }
  0x10   : > { %p887_p9 = por %p109_p6, %p49_p1  ;;  %p558_p12 = scmp.ge.s32.totalorder %s817_s14, 2 }
  0x11   : > { %s892_s23 = scalar_select %p40_p7, %s805_s11, %s42_s18  }
  0x12   : > { %p894_p11 = por %p115_p10, %p55_p3  ;;  %p591_p13 = scmp.lt.s32.totalorder %s817_s14, 2 }
  0x13   : > { %s901_s25 = sand.u32 1, %s805_s11   ;;  %s570_s27 = sshll.u32 %s813_s13, 3 }
  0x14   : > { %s559_s26 = sshll.u32 %s901_s25, 3  ;;  %s145_s30 = scalar_lea.hbm %s1100_s0, %s570_s27 }
  0x15   : > { %s139_s3 = scalar_lea.vmem [#allocation2], %s559_s26  ;;  %s146_s5 = sshll.u32 %s145_s30, 4  ;;  %s147_s5 = int_to_ptr.hbm [resolvable:$true] %s146_s5 }
  0x16   : > { %s148_s4 = sshll.u32 %s139_s3, 4  ;;  %p910_p0 = pnand %p591_p13, %p877_p4  ;;  %s149_s4 = int_to_ptr.vmem [resolvable:$true] %s148_s4 }
  0x17   : > { %p565_p1 = scmp.ge.s32.totalorder %s817_s14, 1  ;;  %s136_s7 = scalar_lea.sflag [#allocation3], %s901_s25 }
  0x18   : > { %s819_s8 = smov 32   ;;  %s820_s15 = smov 2  }
  0x19   : > { %583 = dma.hbm_to_vmem [thread:$0]  (!%p910_p0), %s147_s5, 128, %s149_s4, %s136_s7, %s819_s8, %s819_s8, %s820_s15  }
  0x1a   : > { %p179_p2 = scmp.lt.s32.totalorder %s817_s14, 3  ;;  %s168_s20 = scalar_lea.hbm %s1101_s1, %s570_s27 }
  0x1b   : > { %s169_s28 = sshll.u32 %s168_s20, 4  ;;  %s162_s19 = scalar_lea.vmem [#allocation5], %s559_s26  ;;  %s170_s28 = int_to_ptr.hbm [resolvable:$true] %s169_s28 }
  0x1c   : > { %p180_p3 = pnand %p565_p1, %p179_p2  ;;  %s171_s29 = sshll.u32 %s162_s19, 4  ;;  %s172_s29 = int_to_ptr.vmem [resolvable:$true] %s171_s29 }
  0x1d   : > { %s159_s30 = scalar_lea.sflag [#allocation6], %s901_s25  ;;  %s926_s3 = sand.u32 (!%p180_p3), 1, %s801_s10  }
  0x1e   : > { %586 = dma.hbm_to_vmem [thread:$0]  (!%p910_p0), %s170_s28, 128, %s172_s29, %s159_s30, %s819_s8, %s819_s8, %s820_s15  }
  0x1f   : > { %183 = sbr.rel (%p180_p3) target bundleno = 310 (0x136), region = 28  ;;  %s566_s4 = sshll.u32 (!%p180_p3), %s926_s3, 3 }
  0x20   : > { %s186_s5 = scalar_lea.sflag (!%p180_p3), [#allocation3], %s926_s3  ;;  %s189_s7 = scalar_lea.vmem (!%p180_p3), [#allocation2], %s566_s4 }
  0x24   : > { %784 = dma.done.wait (%p883_p8), %s186_s5, 128  }
  0x25   : > { %786 = vsyncadd (%p883_p8), %s186_s5, 4294967168  ;;  %s196_s25 = scalar_lea.sflag [#allocation6], %s926_s3  ;;  %s935_s26 = scalar_lea.vmem [#allocation5], %s566_s4 }
  0x26   : > { %788 = dma.done.wait (%p883_p8), %s196_s25, 128  }
  0x27   : > { %790 = vsyncadd (%p883_p8), %s196_s25, 4294967168  ;;  %vm233_vm0 = vcmask 1041408   ;;  %v225_v0 = vld [vmem:[%s189_s7] sm:$0x3]  ;;  %v226_v1 = vld [vmem:[%s189_s7 + $0x2] sm:$0x3]  ;;  %s449_s6 = scalar_lea.hbm %s1102_s2, %s809_s12 }
  0x28   : > { %v227_v2 = vld [vmem:[%s189_s7 + $0x4] sm:$0x3]  ;;  %v228_v3 = vld [vmem:[%s189_s7 + $0x6] sm:$0x3]  ;;  %v234_v4 = vsel %vm233_vm0, %v225_v0, -inf  ;;  %v235_v5 = vsel %vm233_vm0, %v226_v1, -inf }
  0x29   : > { %v236_v6 = vsel %vm233_vm0, %v227_v2, -inf  ;;  %v237_v7 = vsel %vm233_vm0, %v228_v3, -inf  ;;  %v238_v8 = vmax.f32 %v234_v4, %v235_v5  ;;  %v962_v46 = vld [vmem:[%s935_s26] sm:$0x3]  ;;  %v965_v47 = vld [vmem:[%s935_s26 + $0x2] sm:$0x3] }
  0x2a   : > { %v239_v9 = vmax.f32 %v236_v6, %v237_v7  ;;  %v968_v49 = vld [vmem:[%s935_s26 + $0x4] sm:$0x3]  ;;  %v971_v53 = vld [vmem:[%s935_s26 + $0x6] sm:$0x3]  ;;  %v332_v59 = vmul.f32 2.0, %v962_v46  ;;  %v333_v60 = vmul.f32 2.0, %v965_v47 }
  0x2b   : > { %v334_v61 = vmul.f32 2.0, %v968_v49  ;;  %s224_s8 = scalar_lea.vmem [#allocation7], %s926_s3  ;;  %s453_s16 = sshll.u32 %s449_s6, 4  ;;  %s454_s16 = int_to_ptr.hbm [resolvable:$true] %s453_s16 }
  0x2c   : > { %v240_v10 = vmax.f32 %v238_v8, %v239_v9  ;;  %s451_s15 = sshll.u32 %s224_s8, 4  ;;  %s440_s20 = scalar_lea.sflag [#allocation4], %s926_s3  ;;  %s452_s15 = int_to_ptr.vmem [resolvable:$true] %s451_s15 }
  0x2d   : > { %s745_s28 = sshra.s32 %s454_s16, 4  ;;  %s751_s30 = scalar_lea.hbm %s1102_s2, 2  ;;  %s746_s28 = int_to_ptr.hbm [resolvable:$true] %s745_s28 }
  0x2e   : > { %v945_v11 = vsub.f32 %v225_v0, %v240_v10  ;;  %v947_v12 = vsub.f32 %v226_v1, %v240_v10  ;;  %v949_v13 = vsub.f32 %v227_v2, %v240_v10  ;;  %v951_v14 = vsub.f32 %v228_v3, %v240_v10  ;;  %s747_s19 = scalar_lea.hbm %s746_s28, 1  ;;  %p752_p7 = scmp.lt.s32.totalorder %s746_s28, %s1102_s2 }
  0x2f   : > { %v335_v1 = vmul.f32 2.0, %v971_v53  ;;  %p748_p4 = scmp.ne.s32.totalorder %s746_s28, %s747_s19  ;;  %p753_p8 = scmp.lt.s32.totalorder %s751_s30, %s747_s19 }
  0x30   : > { %v245_v15 = vmul.f32 1.442695, %v945_v11  ;;  %v247_v16 = vmul.f32 1.442695, %v947_v12  ;;  %v249_v17 = vmul.f32 1.442695, %v949_v13 }
  0x31   : > { %v251_v18 = vmul.f32 1.442695, %v951_v14  ;;  %p749_p5 = pnand %p748_p4, %p887_p9  ;;  %p754_p10 = por %p753_p8, %p752_p7 }
  0x32   : > { %643 = vpow2.f32 %v245_v15 }
  0x33   : > { %645 = vpow2.f32 %v247_v16  ;;  %p750_p6 = pneg %p749_p5 }
  0x34   : > { %647 = vpow2.f32 %v249_v17 }
  0x35   : > { %649 = vpow2.f32 %v251_v18  ;;  %p755_p13 = pnand %p754_p10, %p750_p6 }
  0x38   : > { %v644_v19 = vpop.eup %643 }
  0x39   : > { %v646_v20 = vpop.eup %645  ;;  %v253_v21 = vsel %vm233_vm0, %v644_v19, 0.0 }
  0x3a   : > { %v648_v22 = vpop.eup %647  ;;  %v254_v23 = vsel %vm233_vm0, %v646_v20, 0.0 }
  0x3b   : > { %v650_v24 = vpop.eup %649  ;;  %v255_v25 = vadd.f32 %v254_v23, %v253_v21  ;;  %v256_v26 = vsel %vm233_vm0, %v648_v22, 0.0 }
  0x3c   : > { %v258_v27 = vsel %vm233_vm0, %v650_v24, 0.0 }
  0x3d   : > { %v257_v28 = vadd.f32 %v256_v26, %v255_v25 }
  0x3f   : > { %v259_v29 = vadd.f32 %v258_v27, %v257_v28 }
  0x41   : > { %651 = vrcp.f32 %v259_v29  ;;  %v288_v30 = vsub.f32 %v259_v29, %v644_v19  ;;  %v289_v31 = vsub.f32 %v259_v29, %v646_v20  ;;  %v290_v32 = vsub.f32 %v259_v29, %v648_v22 }
  0x42   : > { %v291_v33 = vsub.f32 %v259_v29, %v650_v24  ;;  %653 = vlog2.f32 %v259_v29  ;;  %vm267_vm1 = vweird.f32 %v259_v29  ;;  %v273_v40 = vand.u32 2147483648, %v259_v29 }
  0x43   : > { %v292_v34 = vmax.f32 %v288_v30, 0.0  ;;  %v293_v35 = vmax.f32 %v289_v31, 0.0  ;;  %v294_v36 = vmax.f32 %v290_v32, 0.0  ;;  %v271_v43 = vand.u32 2147483647, %v259_v29 }
  0x44   : > { %v295_v37 = vmax.f32 %v291_v33, 0.0  ;;  %v274_v51 = vor.u32 1.1754944e-38, %v273_v40 }
  0x45   : > { %655 = vlog2.f32 %v292_v34  ;;  %vm272_vm4 = vcmp.eq.f32.partialorder %v271_v43, 8.507059e+37 }
  0x46   : > { %657 = vlog2.f32 %v293_v35 }
  0x47   : > { %v652_v38 = vpop.eup %651  ;;  %659 = vlog2.f32 %v294_v36 }
  0x48   : > { %v263_v39 = vmul.f32 %v652_v38, %v259_v29  ;;  %v654_v41 = vpop.eup %653  ;;  %vm268_vm2 = vweird.f32 %v652_v38  ;;  %661 = vlog2.f32 %v295_v37 }
  0x49   : > { %v261_v50 = vmul.f32 0.6931472, %v654_v41  ;;  %vm269_vm3 = vmor %vm267_vm1, %vm268_vm2 }
  0x4a   : > { %v264_v42 = vsub.f32 1.0, %v263_v39 }
  0x4b   : > { %v656_v44 = vpop.eup %655  ;;  %v280_v63 = vsub.f32 %v945_v11, %v261_v50  ;;  %v281_v6 = vsub.f32 %v947_v12, %v261_v50  ;;  %v282_v17 = vsub.f32 %v949_v13, %v261_v50  ;;  %v283_v18 = vsub.f32 %v951_v14, %v261_v50 }
  0x4c   : > { %v658_v45 = vpop.eup %657  ;;  %v265_v48 = vmul.f32 %v652_v38, %v264_v42  ;;  %v297_v55 = vmul.f32 0.6931472, %v656_v44 }
  0x4d   : > { %v660_v52 = vpop.eup %659  ;;  %v299_v56 = vmul.f32 0.6931472, %v658_v45  ;;  %v286_v32 = vmax.f32 %v282_v17, -100.0  ;;  %v287_v35 = vmax.f32 %v283_v18, -100.0 }
  0x4e   : > { %v266_v54 = vadd.f32 %v652_v38, %v265_v48  ;;  %v662_v57 = vpop.eup %661  ;;  %v301_v0 = vmul.f32 0.6931472, %v660_v52  ;;  %v304_v8 = vsub.f32 %v297_v55, %v261_v50 }
  0x4f   : > { %v303_v7 = vmul.f32 0.6931472, %v662_v57  ;;  %v305_v9 = vsub.f32 %v299_v56, %v261_v50 }
  0x50   : > { %v270_v58 = vsel %vm269_vm3, %v652_v38, %v266_v54  ;;  %v308_v26 = vmax.f32 %v304_v8, -100.0  ;;  %v402_v8 = vmul.f32 -0.5, %v968_v49 }
  0x51   : > { %v275_v62 = vsel %vm272_vm4, %v274_v51, %v270_v58  ;;  %v307_v25 = vsub.f32 %v303_v7, %v261_v50  ;;  %v309_v27 = vmax.f32 %v305_v9, -100.0 }
  0x52   : > { %v276_v2 = vmul.f32 %v644_v19, %v275_v62  ;;  %v277_v3 = vmul.f32 %v646_v20, %v275_v62  ;;  %v278_v4 = vmul.f32 %v648_v22, %v275_v62  ;;  %v279_v5 = vmul.f32 %v650_v24, %v275_v62 }
  0x53   : > { %v284_v19 = vmax.f32 %v280_v63, -100.0  ;;  %v306_v20 = vsub.f32 %v301_v0, %v261_v50  ;;  %v285_v24 = vmax.f32 %v281_v6, -100.0  ;;  %v311_v36 = vmax.f32 %v307_v25, -100.0 }
  0x54   : > { %v328_v10 = vadd.f32 %v276_v2, %v962_v46  ;;  %v329_v15 = vadd.f32 %v277_v3, %v965_v47  ;;  %v330_v16 = vadd.f32 %v278_v4, %v968_v49  ;;  %v331_v11 = vadd.f32 %v279_v5, %v971_v53 }
  0x55   : > { %v336_v21 = vmul.f32 %v332_v59, %v276_v2  ;;  %v337_v22 = vmul.f32 %v333_v60, %v277_v3  ;;  %v338_v12 = vmul.f32 %v334_v61, %v278_v4  ;;  %v339_v23 = vmul.f32 %v335_v1, %v279_v5 }
  0x56   : > { %v310_v33 = vmax.f32 %v306_v20, -100.0  ;;  %v312_v37 = vsub.f32 %v284_v19, %v308_v26  ;;  %v313_v39 = vsub.f32 %v285_v24, %v309_v27  ;;  %v315_v41 = vsub.f32 %v287_v35, %v311_v36 }
  0x57   : > { %v340_v28 = vsub.f32 %v328_v10, %v336_v21  ;;  %v341_v29 = vsub.f32 %v329_v15, %v337_v22  ;;  %v342_v30 = vsub.f32 %v330_v16, %v338_v12  ;;  %v343_v31 = vsub.f32 %v331_v11, %v339_v23 }
  0x58   : > { %v314_v40 = vsub.f32 %v286_v32, %v310_v33  ;;  %v316_v42 = vmul.f32 %v312_v37, %v962_v46  ;;  %v317_v43 = vmul.f32 %v313_v39, %v965_v47  ;;  %v319_v50 = vmul.f32 %v315_v41, %v971_v53 }
  0x59   : > { %v985_v34 = vmax.f32 %v340_v28, 0.0  ;;  %v987_v13 = vmax.f32 %v341_v29, 0.0  ;;  %v989_v14 = vmax.f32 %v342_v30, 0.0  ;;  %v991_v38 = vmax.f32 %v343_v31, 0.0 }
  0x5a   : > { %v318_v45 = vmul.f32 %v314_v40, %v968_v49  ;;  %v1001_v51 = vadd.f32 %v316_v42, %v308_v26  ;;  %v1004_v55 = vadd.f32 %v317_v43, %v309_v27  ;;  %v400_v60 = vmul.f32 -0.5, %v962_v46 }
  0x5b   : > { %663 = vrsqrt.f32 %v985_v34  ;;  %v401_v0 = vmul.f32 -0.5, %v965_v47  ;;  %v323_v1 = vadd.f32 %v319_v50, %v311_v36  ;;  %vm355_vm5 = vcmp.eq.f32.partialorder %v985_v34, inf }
  0x5c   : > { %665 = vrsqrt.f32 %v987_v13  ;;  %v1009_v61 = vadd.f32 %v318_v45, %v310_v33  ;;  %v324_v2 = vsub.f32 0.0, %v1001_v51  ;;  %v325_v5 = vsub.f32 0.0, %v1004_v55 }
  0x5d   : > { %667 = vrsqrt.f32 %v989_v14  ;;  %v403_v10 = vmul.f32 -0.5, %v971_v53  ;;  %vm357_vm6 = vcmp.eq.f32.partialorder %v985_v34, 0.0  ;;  %v358_v47 = vand.u32 2147483648, %v985_v34 }
  0x5e   : > { %669 = vrsqrt.f32 %v991_v38  ;;  %vm367_vm7 = vcmp.eq.f32.partialorder %v987_v13, inf  ;;  %vm369_vm8 = vcmp.eq.f32.partialorder %v987_v13, 0.0  ;;  %v370_v49 = vand.u32 2147483648, %v987_v13 }
  0x5f   : > { %vm379_vm9 = vcmp.eq.f32.partialorder %v989_v14, inf  ;;  %vm381_vm10 = vcmp.eq.f32.partialorder %v989_v14, 0.0  ;;  %v382_v21 = vand.u32 2147483648, %v989_v14  ;;  %vm391_vm11 = vcmp.eq.f32.partialorder %v991_v38, inf }
  0x60   : > { %vm393_vm12 = vcmp.eq.f32.partialorder %v991_v38, 0.0  ;;  %v394_v25 = vand.u32 2147483648, %v991_v38  ;;  %v404_v26 = vadd.f32 0.75, %v400_v60  ;;  %v405_v30 = vadd.f32 0.75, %v401_v0 }
  0x61   : > { %v664_v44 = vpop.eup %663  ;;  %v406_v35 = vadd.f32 0.75, %v402_v8  ;;  %v407_v40 = vadd.f32 0.75, %v403_v10  ;;  %v326_v41 = vsub.f32 0.0, %v1009_v61  ;;  %v327_v45 = vsub.f32 0.0, %v323_v1 }
  0x62   : > { %v666_v48 = vpop.eup %665  ;;  %v349_v52 = vmul.f32 %v664_v44, %v985_v34 }
  0x63   : > { %v668_v54 = vpop.eup %667  ;;  %v361_v56 = vmul.f32 %v666_v48, %v987_v13 }
  0x64   : > { %v670_v57 = vpop.eup %669  ;;  %v350_v58 = vmul.f32 %v664_v44, %v349_v52  ;;  %v373_v59 = vmul.f32 %v668_v54, %v989_v14 }
  0x65   : > { %v362_v62 = vmul.f32 %v666_v48, %v361_v56  ;;  %v385_v63 = vmul.f32 %v670_v57, %v991_v38 }
  0x66   : > { %v351_v3 = vmul.f32 0.5, %v350_v58  ;;  %v374_v4 = vmul.f32 %v668_v54, %v373_v59 }
  0x67   : > { %v363_v6 = vmul.f32 0.5, %v362_v62  ;;  %v386_v7 = vmul.f32 %v670_v57, %v385_v63 }
  0x68   : > { %v352_v9 = vsub.f32 1.5, %v351_v3  ;;  %v375_v46 = vmul.f32 0.5, %v374_v4 }
  0x69   : > { %v364_v15 = vsub.f32 1.5, %v363_v6  ;;  %v387_v16 = vmul.f32 0.5, %v386_v7 }
  0x6a   : > { %v353_v11 = vmul.f32 %v664_v44, %v352_v9  ;;  %v376_v17 = vsub.f32 1.5, %v375_v46 }
  0x6b   : > { %v365_v18 = vmul.f32 %v666_v48, %v364_v15  ;;  %v388_v19 = vsub.f32 1.5, %v387_v16 }
  0x6c   : > { %v354_v53 = vmul.f32 %v353_v11, %v985_v34  ;;  %v377_v20 = vmul.f32 %v668_v54, %v376_v17 }
  0x6d   : > { %v366_v22 = vmul.f32 %v365_v18, %v987_v13  ;;  %v389_v12 = vmul.f32 %v670_v57, %v388_v19 }
  0x6e   : > { %v356_v23 = vsel %vm355_vm5, %v985_v34, %v354_v53  ;;  %v378_v24 = vmul.f32 %v377_v20, %v989_v14 }
  0x6f   : > { %v359_v27 = vsel %vm357_vm6, %v358_v47, %v356_v23  ;;  %v368_v28 = vsel %vm367_vm7, %v987_v13, %v366_v22  ;;  %v390_v29 = vmul.f32 %v389_v12, %v991_v38 }
  0x70   : > { %v371_v31 = vsel %vm369_vm8, %v370_v49, %v368_v28  ;;  %v380_v32 = vsel %vm379_vm9, %v989_v14, %v378_v24  ;;  %v396_v33 = vmul.f32 %v359_v27, %v985_v34 }
  0x71   : > { %v383_v36 = vsel %vm381_vm10, %v382_v21, %v380_v32  ;;  %v392_v37 = vsel %vm391_vm11, %v991_v38, %v390_v29  ;;  %v397_v39 = vmul.f32 %v371_v31, %v987_v13 }
  0x72   : > { %v395_v42 = vsel %vm393_vm12, %v394_v25, %v392_v37  ;;  %v398_v43 = vmul.f32 %v383_v36, %v989_v14  ;;  %v408_v44 = vmul.f32 %v404_v26, %v396_v33 }
  0x73   : > { %v399_v34 = vmul.f32 %v395_v42, %v991_v38  ;;  %v409_v48 = vmul.f32 %v405_v30, %v397_v39 }
  0x74   : > { %v410_v50 = vmul.f32 %v406_v35, %v398_v43  ;;  %v412_v51 = vmul.f32 %v408_v44, %v324_v2 }
  0x75   : > { %v411_v52 = vmul.f32 %v407_v40, %v399_v34  ;;  %v413_v54 = vmul.f32 %v409_v48, %v325_v5  ;;  %v433_v5 = vlaneseq }
  0x76   : > { %v414_v55 = vmul.f32 %v410_v50, %v326_v41  ;;  %v416_v13 = vsel %vm233_vm0, %v412_v51, 0.0 }
  0x77   : > { %v415_v56 = vmul.f32 %v411_v52, %v327_v45  ;;  %v417_v57 = vsel %vm233_vm0, %v413_v54, 0.0  ;;  %v434_v6 = vand.u32 127, %v433_v5 }
  0x78   : > { %v418_v58 = vadd.f32 %v417_v57, %v416_v13  ;;  %v419_v59 = vsel %vm233_vm0, %v414_v55, 0.0 }
  0x79   : > { %v421_v14 = vsel %vm233_vm0, %v415_v56, 0.0  ;;  %vm435_vm13 = vcmp.eq.s32.totalorder %v434_v6, 0 }
  0x7a   : > { %v420_v60 = vadd.f32 %v419_v59, %v418_v58 }
  0x7c   : > { %v422_v38 = vadd.f32 %v421_v14, %v420_v60 }
  0x7e   : > { %v423_v61 = vsel %vm233_vm0, %v422_v38, 0.0 }
  0x7f   : > { %424 = vadd.xlane.f32.xlu0 %v423_v61 }
  0xf2   : > { %v425_v62 = vpop.xlane.xlu0 %424 }
  0xf3   : > { %v426_v63 = vrot.slane %v425_v62, 4 }
  0xf5   : > { %v427_v0 = vadd.f32 %v426_v63, %v425_v62 }
  0xf7   : > { %v428_v1 = vrot.slane %v427_v0, 2 }
  0xf9   : > { %v429_v2 = vadd.f32 %v428_v1, %v427_v0 }
  0xfb   : > { %v430_v3 = vrot.slane %v429_v2, 1 }
  0xfd   : > { %v431_v4 = vadd.f32 %v430_v3, %v429_v2 }
  0xff   : > { %572 = vpush %v431_v4 }
 0x130   : > { %s573_s18 = spop %572 }
 0x131   : > { %v436_v7 = vstv %s573_s18 }
 0x132   : > { %v437_v8 = vsel %vm435_vm13, %v436_v7, 0.0 }
 0x133   : > { %438 = vst [vmem:[%s224_s8] sm:$0x1] %v437_v8 }
 0x134   : > { %758 = shalt.err (!%p755_p13)
}
 0x135   : > { %578 = dma.vmem_to_hbm [thread:$0]  (%p887_p9), %s452_s15, 16, %s454_s16, %s440_s20  }
 0x136 PF: > { %s465_s3 = sand.u32 1, %s797_s9   ;;  %p588_p0 = pnand %p558_p12, %p894_p11 }
 0x137   : > { %s466_s7 = scalar_lea.sflag [#allocation4], %s465_s3 }
 0x138   : > { %p589_p1 = pneg %p588_p0 }
 0x13a   : > { %792 = dma.done.wait (%p589_p1), %s466_s7, 16  }
 0x13b   : > { %794 = vsyncadd (%p589_p1), %s466_s7, 4294967280  ;;  %s21_s14 = sadd.s32 1, %s817_s14   ;;  %s1108_s9 = smov %s801_s10 }
 0x13c   : > { %p18_p2 = scmp.ge.s32.totalorder %s21_s14, 4   ;;  %s1109_s10 = smov %s805_s11 }
 0x13d   : > { %s1110_s11 = smov %s892_s23  ;;  %s1111_s12 = smov %s813_s13 }
 0x13e   : > { %s1112_s13 = smov %s1114_s17  ;;  %20 = sbr.rel (!%p18_p2) target bundleno = 8 (0x8), region = 86 }
 0x143   :  { %471 = vsyncpa [#allocation3], 1 }
 0x144   :  { %473 = vsyncpa [#allocation3 + $0x1], 1 }
 0x145   :  { %474 = vsyncpa [#allocation6], 1 }
 0x146   :  { %476 = vsyncpa [#allocation6 + $0x1], 1 }
 0x147   :  { %477 = vsyncpa [#allocation4], 1 }
 0x148   :  { %479 = vsyncpa [#allocation4 + $0x1], 1 }

</bundles_post_ra>
